<compile_context>
chip_gen: v5e
topology: v5e:2x2
jax: 0.10.0
libtpu: 0.0.40
codegen_flags: <defaults>
</compile_context>

<pallas_src>
import jax
import jax.numpy as jnp
from jax.experimental import pallas as pl
from jax.experimental.pallas import tpu as pltpu


def _round_up(n, m):
    return ((n + m - 1) // m) * m


def sae_kernel(x_ref, w_enc_ref, b_enc_ref, w_dec_ref, b_dec_ref,
               enc_ref, dec_ref, acc_ref):
    """One (batch-tile i, hidden-tile k) grid step.

    encoder : enc[i, k] = relu(x[i] @ W_enc[:, k] + b_enc[k])   (written per k)
    decoder : acc[i]   += enc[i, k] @ W_dec[k, :]               (reduce over k)
              dec[i]    = sigmoid(acc[i] + b_dec)               (at k == last)
    """
    k = pl.program_id(1)

    # --- Encoder tile: bf16 operands on the MXU, f32 accumulate/elementwise ---
    h = jnp.dot(x_ref[...], w_enc_ref[...], preferred_element_type=jnp.float32)
    h = h + b_enc_ref[...]               # (1, th) broadcasts over batch rows
    encoded = jnp.maximum(h, 0.0)        # f32 ReLU (VPU)
    enc_ref[...] = encoded.astype(enc_ref.dtype)

    # --- Decoder partial product for this hidden tile (bf16 -> f32 acc) ---
    partial = jnp.dot(encoded.astype(w_dec_ref.dtype), w_dec_ref[...],
                      preferred_element_type=jnp.float32)

    @pl.when(k == 0)
    def _():
        acc_ref[...] = partial

    @pl.when(k > 0)
    def _():
        acc_ref[...] += partial

    # --- Epilogue: bias + sigmoid only after the last hidden tile ---
    @pl.when(k == pl.num_programs(1) - 1)
    def _():
        dec_ref[...] = jax.nn.sigmoid(
            acc_ref[...] + b_dec_ref[...]).astype(dec_ref.dtype)


def sparse_autoencoder_forward(x, w_enc, b_enc, w_dec, b_dec):
    """x: (B, ...) array; w_enc: (in, hid); w_dec: (hid, in); biases 1-D or (1, n)."""
    B = x.shape[0]
    x_flat = x.reshape(B, -1)                      # torch: x.view(x.size(0), -1)
    input_size = x_flat.shape[1]
    hidden_size = w_enc.shape[1]

    # Pad lane dims to multiples of 128 (unmasked vst), batch to the batch tile.
    in_p = _round_up(input_size, 128)
    hid_p = _round_up(hidden_size, 128)

    # Batch tile: 256 fills the 256x256 MXU (v6e/v7x), 128 fills v5e's; tiny
    # batches just round up to a sublane multiple.
    if B >= 512:
        tm = 256
    elif B >= 128:
        tm = 128
    else:
        tm = _round_up(B, 8)
    B_p = _round_up(B, tm)

    # Hidden tile: largest of {512, 256, 128} that divides the padded hidden
    # size, bounding resident W_enc/W_dec slabs (v7x 64 MiB VMEM budget).
    if hid_p % 512 == 0:
        th = 512
    elif hid_p % 256 == 0:
        th = 256
    else:
        th = 128
    num_m = B_p // tm
    num_k = hid_p // th
    # TODO(synk): for very large input_size, add a third grid axis tiling in_p.

    f32, bf16 = jnp.float32, jnp.bfloat16

    # bf16 matmul operands at rest in HBM; f32 biases. Zero padding keeps the
    # padded rows/cols numerically inert (they are sliced away at the end).
    x_p = jnp.zeros((B_p, in_p), bf16).at[:B, :input_size].set(
        x_flat.astype(bf16))
    w_enc_p = jnp.zeros((in_p, hid_p), bf16).at[:input_size, :hidden_size].set(
        w_enc.astype(bf16))
    b_enc_p = jnp.zeros((1, hid_p), f32).at[:, :hidden_size].set(
        jnp.reshape(b_enc, (1, -1)).astype(f32))
    w_dec_p = jnp.zeros((hid_p, in_p), bf16).at[:hidden_size, :input_size].set(
        w_dec.astype(bf16))
    b_dec_p = jnp.zeros((1, in_p), f32).at[:, :input_size].set(
        jnp.reshape(b_dec, (1, -1)).astype(f32))

    cost = pl.CostEstimate(
        flops=4 * B_p * in_p * hid_p,            # two matmuls
        transcendentals=B_p * in_p,              # sigmoid
        bytes_accessed=(x_p.size * 2 + w_enc_p.size * 2 + w_dec_p.size * 2
                        + b_enc_p.size * 4 + b_dec_p.size * 4
                        + B_p * hid_p * 4 + B_p * in_p * 4),
    )

    encoded, decoded = pl.pallas_call(
        sae_kernel,
        out_shape=(
            jax.ShapeDtypeStruct((B_p, hid_p), f32),
            jax.ShapeDtypeStruct((B_p, in_p), f32),
        ),
        grid=(num_m, num_k),
        in_specs=[
            pl.BlockSpec((tm, in_p), lambda i, k: (i, 0)),      # x tile
            pl.BlockSpec((in_p, th), lambda i, k: (0, k)),      # W_enc slab
            pl.BlockSpec((1, th), lambda i, k: (0, k)),         # b_enc slab
            pl.BlockSpec((th, in_p), lambda i, k: (k, 0)),      # W_dec slab
            pl.BlockSpec((1, in_p), lambda i, k: (0, 0)),       # b_dec (const)
        ],
        out_specs=(
            pl.BlockSpec((tm, th), lambda i, k: (i, k)),        # encoded
            pl.BlockSpec((tm, in_p), lambda i, k: (i, 0)),      # decoded (acc)
        ),
        scratch_shapes=[pltpu.VMEM((tm, in_p), f32)],           # f32 accumulator
        compiler_params=pltpu.CompilerParams(
            dimension_semantics=("parallel", "arbitrary"),
            vmem_limit_bytes=32 * 1024 * 1024,
        ),
        cost_estimate=cost,
    )(x_p, w_enc_p, b_enc_p, w_dec_p, b_dec_p)

    return encoded[:B, :hidden_size], decoded[:B, :input_size]


def init_params(key, input_size, hidden_size):
    """nn.Linear-style U(-1/sqrt(fan_in), 1/sqrt(fan_in)) init.

    Weights are stored pre-transposed: (in_features, out_features)."""
    k1, k2, k3, k4 = jax.random.split(key, 4)
    lim_e = 1.0 / jnp.sqrt(input_size)
    lim_d = 1.0 / jnp.sqrt(hidden_size)
    w_enc = jax.random.uniform(k1, (input_size, hidden_size), jnp.float32,
                               minval=-lim_e, maxval=lim_e)
    b_enc = jax.random.uniform(k2, (hidden_size,), jnp.float32,
                               minval=-lim_e, maxval=lim_e)
    w_dec = jax.random.uniform(k3, (hidden_size, input_size), jnp.float32,
                               minval=-lim_d, maxval=lim_d)
    b_dec = jax.random.uniform(k4, (input_size,), jnp.float32,
                               minval=-lim_d, maxval=lim_d)
    return w_enc, b_enc, w_dec, b_dec


if __name__ == "__main__":
    # Small shapes: batch=8, NCHW input (8, 4, 8, 8) -> input_size=256, hidden=128.
    B, C, H, W = 8, 4, 8, 8
    input_size = C * H * W
    hidden_size = 128

    key = jax.random.PRNGKey(0)
    kx, kp = jax.random.split(key)
    x = jax.random.normal(kx, (B, C, H, W), dtype=jnp.float32)
    w_enc, b_enc, w_dec, b_dec = init_params(kp, input_size, hidden_size)

    encoded, decoded = sparse_autoencoder_forward(x, w_enc, b_enc, w_dec, b_dec)
    jax.block_until_ready((encoded, decoded))

    # Pure-JAX f32 reference; kernel uses bf16 matmul operands -> loose tolerance.
    x_flat = x.reshape(B, -1)
    enc_ref = jnp.maximum(x_flat @ w_enc + b_enc, 0.0)
    dec_ref = jax.nn.sigmoid(enc_ref @ w_dec + b_dec)
    assert encoded.shape == (B, hidden_size)
    assert decoded.shape == (B, input_size)
    assert jnp.allclose(encoded, enc_ref, atol=3e-2, rtol=3e-2), (
        float(jnp.max(jnp.abs(encoded - enc_ref))))
    assert jnp.allclose(decoded, dec_ref, atol=3e-2, rtol=3e-2), (
        float(jnp.max(jnp.abs(decoded - dec_ref))))

    print("KERNEL_OK")
</pallas_src>

<mosaic_0001>
module attributes {stable_mosaic.version = 11 : i64} {
  func.func @sae_kernel(%arg0: i32, %arg1: i32, %arg2: memref<8x256xbf16, #tpu.memory_space<vmem>>, %arg3: memref<256x128xbf16, #tpu.memory_space<vmem>>, %arg4: memref<1x128xf32, #tpu.memory_space<vmem>>, %arg5: memref<128x256xbf16, #tpu.memory_space<vmem>>, %arg6: memref<1x256xf32, #tpu.memory_space<vmem>>, %arg7: memref<8x128xf32, #tpu.memory_space<vmem>>, %arg8: memref<8x256xf32, #tpu.memory_space<vmem>>, %arg9: memref<8x256xf32, #tpu.memory_space<vmem>>) attributes {dimension_semantics = [#tpu.dimension_semantics<parallel>, #tpu.dimension_semantics<arbitrary>], iteration_bounds = array<i64: 1, 1>, scalar_prefetch = 0 : i64, scratch_operands = 1 : i64, tpu.core_type = #tpu.core_type<tc>, window_params = [{transform_indices = @transform_0, window_bounds = array<i64: 8, 256>}, {transform_indices = @transform_1, window_bounds = array<i64: 256, 128>}, {transform_indices = @transform_2, window_bounds = array<i64: 1, 128>}, {transform_indices = @transform_3, window_bounds = array<i64: 128, 256>}, {pipeline_mode = #tpu.pipeline_mode<synchronous>, transform_indices = @transform_4, window_bounds = array<i64: 1, 256>}, {transform_indices = @transform_5, window_bounds = array<i64: 8, 128>}, {transform_indices = @transform_6, window_bounds = array<i64: 8, 256>}]} {
    %c0 = arith.constant 0 : index
    %c0_0 = arith.constant 0 : index
    %0 = vector.load %arg2[%c0, %c0_0] : memref<8x256xbf16, #tpu.memory_space<vmem>>, vector<8x256xbf16>
    %c0_1 = arith.constant 0 : index
    %c0_2 = arith.constant 0 : index
    %1 = vector.load %arg3[%c0_1, %c0_2] : memref<256x128xbf16, #tpu.memory_space<vmem>>, vector<256x128xbf16>
    %cst = arith.constant dense<0.000000e+00> : vector<8x128xf32>
    %2 = tpu.matmul %0, %1, %cst {dimension_numbers = #tpu.dot_dimension_numbers<[1], [0], [0], [1], [0, 0, 1, 1], [], []>} : vector<8x256xbf16>, vector<256x128xbf16>, vector<8x128xf32> -> vector<8x128xf32>
    %c0_3 = arith.constant 0 : index
    %c0_4 = arith.constant 0 : index
    %3 = vector.load %arg4[%c0_3, %c0_4] : memref<1x128xf32, #tpu.memory_space<vmem>>, vector<1x128xf32>
    %4 = vector.broadcast %3 : vector<1x128xf32> to vector<8x128xf32>
    %5 = arith.addf %2, %4 : vector<8x128xf32>
    %cst_5 = arith.constant 0.000000e+00 : f32
    %6 = vector.broadcast %cst_5 : f32 to vector<8x128xf32>
    %7 = arith.maximumf %5, %6 : vector<8x128xf32>
    %c0_6 = arith.constant 0 : index
    %c0_7 = arith.constant 0 : index
    %8 = vector.load %arg7[%c0_6, %c0_7] : memref<8x128xf32, #tpu.memory_space<vmem>>, vector<8x128xf32>
    tpu.vector_store %arg7[%c0_6, %c0_7], %7 {strides = array<i32>} : memref<8x128xf32, #tpu.memory_space<vmem>>, vector<8x128xf32>,
    %9 = arith.truncf %7 : vector<8x128xf32> to vector<8x128xbf16>
    %c0_8 = arith.constant 0 : index
    %c0_9 = arith.constant 0 : index
    %10 = vector.load %arg5[%c0_8, %c0_9] : memref<128x256xbf16, #tpu.memory_space<vmem>>, vector<128x256xbf16>
    %cst_10 = arith.constant dense<0.000000e+00> : vector<8x256xf32>
    %11 = tpu.matmul %9, %10, %cst_10 {dimension_numbers = #tpu.dot_dimension_numbers<[1], [0], [0], [1], [0, 0, 1, 1], [], []>} : vector<8x128xbf16>, vector<128x256xbf16>, vector<8x256xf32> -> vector<8x256xf32>
    %c0_i32 = arith.constant 0 : i32
    %12 = arith.cmpi eq, %arg1, %c0_i32 : i32
    %13 = arith.extui %12 : i1 to i32
    %c0_i32_11 = arith.constant 0 : i32
    %14 = arith.cmpi ne, %13, %c0_i32_11 : i32
    scf.if %14 {
      %c0_16 = arith.constant 0 : index
      %c0_17 = arith.constant 0 : index
      %21 = vector.load %arg9[%c0_16, %c0_17] : memref<8x256xf32, #tpu.memory_space<vmem>>, vector<8x256xf32>
      tpu.vector_store %arg9[%c0_16, %c0_17], %11 {strides = array<i32>} : memref<8x256xf32, #tpu.memory_space<vmem>>, vector<8x256xf32>,
    } else {
    }
    %c0_i32_12 = arith.constant 0 : i32
    %15 = arith.cmpi sgt, %arg1, %c0_i32_12 : i32
    %16 = arith.extui %15 : i1 to i32
    %c0_i32_13 = arith.constant 0 : i32
    %17 = arith.cmpi ne, %16, %c0_i32_13 : i32
    scf.if %17 {
      %c0_16 = arith.constant 0 : index
      %c0_17 = arith.constant 0 : index
      %21 = vector.load %arg9[%c0_16, %c0_17] : memref<8x256xf32, #tpu.memory_space<vmem>>, vector<8x256xf32>
      %22 = arith.addf %21, %11 : vector<8x256xf32>
      %c0_18 = arith.constant 0 : index
      %c0_19 = arith.constant 0 : index
      %23 = vector.load %arg9[%c0_18, %c0_19] : memref<8x256xf32, #tpu.memory_space<vmem>>, vector<8x256xf32>
      tpu.vector_store %arg9[%c0_18, %c0_19], %22 {strides = array<i32>} : memref<8x256xf32, #tpu.memory_space<vmem>>, vector<8x256xf32>,
    } else {
    }
    %c0_i32_14 = arith.constant 0 : i32
    %18 = arith.cmpi eq, %arg1, %c0_i32_14 : i32
    %19 = arith.extui %18 : i1 to i32
    %c0_i32_15 = arith.constant 0 : i32
    %20 = arith.cmpi ne, %19, %c0_i32_15 : i32
    scf.if %20 {
      %c0_16 = arith.constant 0 : index
      %c0_17 = arith.constant 0 : index
      %21 = vector.load %arg9[%c0_16, %c0_17] : memref<8x256xf32, #tpu.memory_space<vmem>>, vector<8x256xf32>
      %c0_18 = arith.constant 0 : index
      %c0_19 = arith.constant 0 : index
      %22 = vector.load %arg6[%c0_18, %c0_19] : memref<1x256xf32, #tpu.memory_space<vmem>>, vector<1x256xf32>
      %23 = vector.broadcast %22 : vector<1x256xf32> to vector<8x256xf32>
      %24 = arith.addf %21, %23 : vector<8x256xf32>
      %25 = arith.negf %24 : vector<8x256xf32>
      %26 = math.exp %25 : vector<8x256xf32>
      %cst_20 = arith.constant 1.000000e+00 : f32
      %27 = vector.broadcast %cst_20 : f32 to vector<8x256xf32>
      %28 = arith.addf %27, %26 : vector<8x256xf32>
      %29 = arith.divf %27, %28 : vector<8x256xf32>
      %c0_21 = arith.constant 0 : index
      %c0_22 = arith.constant 0 : index
      %30 = vector.load %arg8[%c0_21, %c0_22] : memref<8x256xf32, #tpu.memory_space<vmem>>, vector<8x256xf32>
      tpu.vector_store %arg8[%c0_21, %c0_22], %29 {strides = array<i32>} : memref<8x256xf32, #tpu.memory_space<vmem>>, vector<8x256xf32>,
    } else {
    }
    return
  }
  func.func @transform_0(%arg0: i32, %arg1: i32) -> (i32, i32) {
    %c0_i32 = arith.constant 0 : i32
    %c0_i32_0 = arith.constant 0 : i32
    return %arg0, %c0_i32 : i32, i32
  }
  func.func @transform_1(%arg0: i32, %arg1: i32) -> (i32, i32) {
    %c0_i32 = arith.constant 0 : i32
    %c0_i32_0 = arith.constant 0 : i32
    return %c0_i32, %arg1 : i32, i32
  }
  func.func @transform_2(%arg0: i32, %arg1: i32) -> (i32, i32) {
    %c0_i32 = arith.constant 0 : i32
    %c0_i32_0 = arith.constant 0 : i32
    return %c0_i32, %arg1 : i32, i32
  }
  func.func @transform_3(%arg0: i32, %arg1: i32) -> (i32, i32) {
    %c0_i32 = arith.constant 0 : i32
    %c0_i32_0 = arith.constant 0 : i32
    return %arg1, %c0_i32 : i32, i32
  }
  func.func @transform_4(%arg0: i32, %arg1: i32) -> (i32, i32) {
    %c0_i32 = arith.constant 0 : i32
    %c0_i32_0 = arith.constant 0 : i32
    %c0_i32_1 = arith.constant 0 : i32
    return %c0_i32, %c0_i32_0 : i32, i32
  }
  func.func @transform_5(%arg0: i32, %arg1: i32) -> (i32, i32) {
    %c0_i32 = arith.constant 0 : i32
    return %arg0, %arg1 : i32, i32
  }
  func.func @transform_6(%arg0: i32, %arg1: i32) -> (i32, i32) {
    %c0_i32 = arith.constant 0 : i32
    %c0_i32_0 = arith.constant 0 : i32
    return %arg0, %c0_i32 : i32, i32
  }
}

</mosaic_0001>

<bundles_post_ra>
// kernel: tpu_custom_call.1
= control target key start
LH: loop header
LB: loop body
LE: loop exit
PB: predicated region body
PF: predicated region fallthrough
CT: control target
= control target key end

     0   :  { %12 = vsyncpa [#allocation4], 0  ;;  %s836_s0 = inlined_call_operand.hbm [shape: bf16[8,256], index: 0, kind: input, shape index: {}]   ;;  %s837_s1 = inlined_call_operand.hbm [shape: bf16[256,128], index: 1, kind: input, shape index: {}]   ;;  %s838_s2 = inlined_call_operand.vmem [shape: f32[1,128], index: 2, kind: input, shape index: {}]   ;;  %s839_s3 = inlined_call_operand.hbm [shape: bf16[128,256], index: 3, kind: input, shape index: {}]   ;;  %s840_s4 = inlined_call_operand.vmem [shape: f32[1,256], index: 4, kind: input, shape index: {}]   ;;  %s841_s5 = inlined_call_operand.hbm [shape: f32[8,128], index: 5, kind: output, shape index: {0}]   ;;  %s842_s6 = inlined_call_operand.hbm [shape: f32[8,256], index: 6, kind: output, shape index: {1}]  }
   0x1   :  { %13 = vsyncpa [#allocation7], 0 }
   0x2   :  { %14 = vsyncpa [#allocation5], 0  ;;  %s31_s23 = sshll.u32 %s837_s1, 4  ;;  %s32_s23 = int_to_ptr.hbm [resolvable:$true] %s31_s23 }
   0x3   :  { %15 = vsyncpa [#allocation11], 0  ;;  %s771_s24 = smov [#allocation6]   ;;  %s21_s28 = sshll.u32 %s836_s0, 4  ;;  %s22_s28 = int_to_ptr.hbm [resolvable:$true] %s21_s28 }
   0x4   :  { %s33_s25 = sshll.u32 %s771_s24, 4  ;;  %s772_s29 = smov 64   ;;  %s34_s25 = int_to_ptr.vmem [resolvable:$true] %s33_s25 }
   0x5   :  { %s773_s30 = smov 4   ;;  %s774_s7 = smov [#allocation3]  }
   0x6   :  { %39 = dma.hbm_to_vmem [thread:$0]  %s32_s23, 2048, %s34_s25, [#allocation7], %s772_s29, %s772_s29, %s773_s30  }
   0x7   :  { %s23_s8 = sshll.u32 %s774_s7, 4  ;;  %s46_s11 = sshll.u32 %s839_s3, 4  ;;  %s24_s8 = int_to_ptr.vmem [resolvable:$true] %s23_s8  ;;  %s47_s11 = int_to_ptr.hbm [resolvable:$true] %s46_s11 }
   0x8   :  { %26 = dma.hbm_to_vmem [thread:$0]  %s22_s28, 128, %s24_s8, [#allocation4]  }
   0x9   :  { %s775_s1 = smov [#allocation8]   ;;  %s776_s13 = smov 128  }
   0xa   :  { %s48_s12 = sshll.u32 %s775_s1, 4  ;;  %s777_s14 = smov 8   ;;  %s49_s12 = int_to_ptr.vmem [resolvable:$true] %s48_s12 }
   0xb   :  { %54 = dma.hbm_to_vmem [thread:$0]  %s47_s11, 2048, %s49_s12, [#allocation7], %s776_s13, %s776_s13, %s777_s14  }
   0xc   :  { %763 = dma.done.wait [#allocation4], 128  }
   0xd   :  { %764 = vsyncadd [#allocation4], 4294967168 }
   0xe   :  { %765 = dma.done.wait [#allocation7], 4096  }
   0xf   :  { %766 = vsyncadd [#allocation7], 4294963200  ;;  %v600_v0 = vld [vmem:[#allocation6 + $0x38] sm:$0xff]  ;;  %v599_v2 = vld [vmem:[#allocation6 + $0x30] sm:$0xff]  ;;  %s436_s17 = sshll.u32 %s841_s5, 4  ;;  %s778_s18 = smov [#allocation9]   ;;  %s437_s17 = int_to_ptr.hbm [resolvable:$true] %s436_s17 }
  0x10   :  { %v608_v1 = vld [vmem:[#allocation6 + $0x78] sm:$0xff]  ;;  %209 = vmatpush.bf16.msra.mxu0 %v600_v0  ;;  %v607_v3 = vld [vmem:[#allocation6 + $0x70] sm:$0xff]  ;;  %v598_v4 = vld [vmem:[#allocation6 + $0x28] sm:$0xff]  ;;  %s434_s19 = sshll.u32 %s778_s18, 4  ;;  %s447_s23 = sshll.u32 %s842_s6, 4  ;;  %s435_s19 = int_to_ptr.vmem [resolvable:$true] %s434_s19  ;;  %s448_s23 = int_to_ptr.hbm [resolvable:$true] %s447_s23 }
  0x11   :  { %222 = vmatpush.bf16.msra.mxu1 %v608_v1  ;;  %v606_v5 = vld [vmem:[#allocation6 + $0x68] sm:$0xff]  ;;  %v585_v6 = vld [vmem:[#allocation8 + $0x70] sm:$0xf]  ;;  %v624_v7 = vld [vmem:[#allocation8 + $0x74] sm:$0xf0] }
  0x12   :  { %v623_v8 = vld [vmem:[#allocation8 + $0x74] sm:$0xf]  ;;  %v587_v9 = vld [vmem:[#allocation8 + $0x78] sm:$0xf0]  ;;  %v586_v10 = vor.u32 %v624_v7, %v585_v6  ;;  %v577_v12 = vld [vmem:[#allocation8 + $0x60] sm:$0xf] }
  0x13   :  { %v590_v11 = vor.u32 %v623_v8, %v587_v9  ;;  %v622_v13 = vld [vmem:[#allocation8 + $0x64] sm:$0xf0]  ;;  %v621_v14 = vld [vmem:[#allocation8 + $0x64] sm:$0xf]  ;;  %v579_v15 = vld [vmem:[#allocation8 + $0x68] sm:$0xf0] }
  0x14   :  { %210 = vmatpush.bf16.msra.mxu0 %v599_v2  ;;  %v597_v16 = vld [vmem:[#allocation6 + $0x20] sm:$0xff]  ;;  %334 = vmatpush.bf16.msra.mxu2 %v586_v10  ;;  %v578_v18 = vor.u32 %v622_v13, %v577_v12  ;;  %v582_v19 = vor.u32 %v621_v14, %v579_v15  ;;  %v569_v20 = vld [vmem:[#allocation8 + $0x50] sm:$0xf]  ;;  %v620_v21 = vld [vmem:[#allocation8 + $0x54] sm:$0xf0] }
  0x15   :  { %223 = vmatpush.bf16.msra.mxu1 %v607_v3  ;;  %v605_v17 = vld [vmem:[#allocation6 + $0x60] sm:$0xff]  ;;  %347 = vmatpush.bf16.msra.mxu3 %v590_v11  ;;  %v619_v22 = vld [vmem:[#allocation8 + $0x54] sm:$0xf]  ;;  %v571_v23 = vld [vmem:[#allocation8 + $0x58] sm:$0xf0]  ;;  %v570_v26 = vor.u32 %v620_v21, %v569_v20 }
  0x16   :  { %v596_v24 = vld [vmem:[#allocation6 + $0x18] sm:$0xff]  ;;  %v574_v27 = vor.u32 %v619_v22, %v571_v23  ;;  %v561_v28 = vld [vmem:[#allocation8 + $0x40] sm:$0xf]  ;;  %v618_v29 = vld [vmem:[#allocation8 + $0x44] sm:$0xf0] }
  0x17   :  { %v604_v25 = vld [vmem:[#allocation6 + $0x58] sm:$0xff]  ;;  %v617_v30 = vld [vmem:[#allocation8 + $0x44] sm:$0xf]  ;;  %v563_v31 = vld [vmem:[#allocation8 + $0x48] sm:$0xf0]  ;;  %v562_v34 = vor.u32 %v618_v29, %v561_v28 }
  0x18   :  { %211 = vmatpush.bf16.msra.mxu0 %v598_v4  ;;  %335 = vmatpush.bf16.msra.mxu2 %v578_v18  ;;  %v595_v32 = vld [vmem:[#allocation6 + $0x10] sm:$0xff]  ;;  %v566_v35 = vor.u32 %v617_v30, %v563_v31  ;;  %v616_v37 = vld [vmem:[#allocation8 + $0x34] sm:$0xf0]  ;;  %v555_v39 = vld [vmem:[#allocation8 + $0x38] sm:$0xf0] }
  0x19   :  { %224 = vmatpush.bf16.msra.mxu1 %v606_v5  ;;  %348 = vmatpush.bf16.msra.mxu3 %v582_v19  ;;  %v603_v33 = vld [vmem:[#allocation6 + $0x50] sm:$0xff]  ;;  %v594_v40 = vld [vmem:[#allocation6 + $0x8] sm:$0xff]  ;;  %v69_v42 = vld [vmem:[#allocation3] sm:$0xff] }
  0x1a   :  { %v553_v36 = vld [vmem:[#allocation8 + $0x30] sm:$0xf]  ;;  %v615_v38 = vld [vmem:[#allocation8 + $0x34] sm:$0xf]  ;;  %v602_v41 = vld [vmem:[#allocation6 + $0x48] sm:$0xff]  ;;  %v107_v49 = vunpack.c.l.b16 %v69_v42  ;;  %v108_v50 = vunpack.c.h.b16 %v69_v42 }
  0x1b   :  { %v554_v43 = vor.u32 %v616_v37, %v553_v36  ;;  %v558_v44 = vor.u32 %v615_v38, %v555_v39  ;;  %v545_v45 = vld [vmem:[#allocation8 + $0x20] sm:$0xf]  ;;  %v614_v46 = vld [vmem:[#allocation8 + $0x24] sm:$0xf0]  ;;  %v613_v47 = vld [vmem:[#allocation8 + $0x24] sm:$0xf] }
  0x1c   :  { %212 = vmatpush.bf16.msra.mxu0 %v597_v16  ;;  %336 = vmatpush.bf16.msra.mxu2 %v570_v26  ;;  %v547_v48 = vld [vmem:[#allocation8 + $0x28] sm:$0xf0]  ;;  %v546_v51 = vor.u32 %v614_v46, %v545_v45  ;;  %v593_v53 = vld [vmem:[#allocation6] sm:$0xff]  ;;  %v109_v55 = vpack.c.b16 %v107_v49, %v107_v49  ;;  %v110_v56 = vpack.c.b16 %v108_v50, %v108_v50  ;;  %v537_v57 = vld [vmem:[#allocation8 + $0x10] sm:$0xf] }
  0x1d   :  { %225 = vmatpush.bf16.msra.mxu1 %v605_v17  ;;  %349 = vmatpush.bf16.msra.mxu3 %v574_v27  ;;  %v550_v52 = vor.u32 %v613_v47, %v547_v48  ;;  %v601_v54 = vld [vmem:[#allocation6 + $0x40] sm:$0xff]  ;;  %v612_v58 = vld [vmem:[#allocation8 + $0x14] sm:$0xf0]  ;;  %v611_v59 = vld [vmem:[#allocation8 + $0x14] sm:$0xf] }
  0x1e   :  { %v538_v60 = vor.u32 %v612_v58, %v537_v57  ;;  %v539_v61 = vld [vmem:[#allocation8 + $0x18] sm:$0xf0]  ;;  %v529_v63 = vld [vmem:[#allocation8] sm:$0xf]  ;;  %v610_v0 = vld [vmem:[#allocation8 + $0x4] sm:$0xf0] }
  0x1f   :  { %v542_v62 = vor.u32 %v611_v59, %v539_v61  ;;  %v609_v1 = vld [vmem:[#allocation8 + $0x4] sm:$0xf]  ;;  %v530_v2 = vor.u32 %v610_v0, %v529_v63  ;;  %v531_v3 = vld [vmem:[#allocation8 + $0x8] sm:$0xf0]  ;;  %v634_v5 = vld [vmem:[%s838_s2] ss:$0 sm:$0xff] }
  0x20   :  { %213 = vmatpush.bf16.msra.mxu0 %v596_v24  ;;  %337 = vmatpush.bf16.msra.mxu2 %v562_v34  ;;  %v534_v4 = vor.u32 %v609_v1, %v531_v3  ;;  %v381_v14 = vld [vmem:[%s840_s4] sm:$0x3]  ;;  %s779_s4 = smov [#allocation10]  }
  0x21   :  { %226 = vmatpush.bf16.msra.mxu1 %v604_v25  ;;  %350 = vmatpush.bf16.msra.mxu3 %v566_v35  ;;  %v383_v15 = vperm.slane %v381_v14, 0  ;;  %v384_v16 = vperm.slane %v381_v14, 1  ;;  %s445_s5 = sshll.u32 %s779_s4, 4  ;;  %s446_s5 = int_to_ptr.vmem [resolvable:$true] %s445_s5 }
  0x24   :  { %214 = vmatpush.bf16.msra.mxu0 %v595_v32  ;;  %338 = vmatpush.bf16.msra.mxu2 %v554_v43 }
  0x25   :  { %227 = vmatpush.bf16.msra.mxu1 %v603_v33  ;;  %351 = vmatpush.bf16.msra.mxu3 %v558_v44 }
  0x28   :  { %215 = vmatpush.bf16.msra.mxu0 %v594_v40  ;;  %339 = vmatpush.bf16.msra.mxu2 %v546_v51 }
  0x29   :  { %228 = vmatpush.bf16.msra.mxu1 %v602_v41  ;;  %352 = vmatpush.bf16.msra.mxu3 %v550_v52 }
  0x2c   :  { %216 = vmatpush.bf16.msra.mxu0 %v593_v53  ;;  %340 = vmatpush.bf16.msra.mxu2 %v538_v60 }
  0x2d   :  { %229 = vmatpush.bf16.msra.mxu1 %v601_v54  ;;  %353 = vmatpush.bf16.msra.mxu3 %v542_v62 }
  0x2f   :  { %217 = vmatmul.bf16.vlgmr.msra.gmra.mxu0 %v109_v55 }
  0x30   :  { %230 = vmatmul.bf16.vlgmr.msra.gmra.mxu1 %v110_v56  ;;  %341 = vmatpush.bf16.msra.mxu2 %v530_v2 }
  0x31   :  { %354 = vmatpush.bf16.msra.mxu3 %v534_v4 }
  0xac   :  { %v218_v6 = vpop.f32.mrf.mxu0 }
  0xad   :  { %v231_v7 = vpop.f32.mrf.mxu1  ;;  %v219_v8 = vadd.f32 %v634_v5, %v218_v6 }
  0xaf   :  { %v232_v9 = vadd.f32 %v231_v7, %v219_v8 }
  0xb1   :  { %v235_v10 = vmax.f32 %v232_v9, 0.0 }
  0xb3   :  { %236 = vst [vmem:[#allocation9] sm:$0xff] %v235_v10  ;;  %v237_v11 = vpack.c.bf16 %v235_v10, %v235_v10 }
  0xb4   :  { %v220_v12 = vpop.f32.mrf.mxu0  ;;  %439 = dma.vmem_to_hbm [thread:$0]  %s435_s19, 128, %s437_s17, [#allocation5]  }
  0xb5   :  { %v233_v13 = vpop.f32.mrf.mxu1  ;;  %342 = vmatmul.bf16.vlgmr.msra.gmra.mxu2 %v237_v11  ;;  %355 = vmatmul.bf16.vlgmr.msra.gmra.mxu3 %v237_v11 }
 0x138   :  { %v343_v17 = vpop.f32.mrf.mxu2  ;;  %v356_v18 = vpop.f32.mrf.mxu3 }
 0x139   :  { %v387_v19 = vadd.f32 %v383_v15, %v343_v17  ;;  %v388_v20 = vadd.f32 %v384_v16, %v356_v18 }
 0x13b   :  { %v591_v21 = vmul.f32 -1.442695, %v387_v19  ;;  %v592_v22 = vmul.f32 -1.442695, %v388_v20 }
 0x13d   :  { %635 = vpow2.f32 %v591_v21 }
 0x13e   :  { %637 = vpow2.f32 %v592_v22 }
 0x140   :  { %v345_v23 = vpop.f32.mrf.mxu2  ;;  %v358_v24 = vpop.f32.mrf.mxu3 }
 0x143   :  { %v636_v25 = vpop.eup %635 }
 0x144   :  { %v638_v26 = vpop.eup %637  ;;  %v395_v27 = vadd.f32 1.0, %v636_v25 }
 0x145   :  { %v396_v28 = vadd.f32 1.0, %v638_v26 }
 0x146   :  { %639 = vrcp.f32 %v395_v27  ;;  %v408_v35 = vand.u32 2147483648, %v395_v27  ;;  %v406_v37 = vand.u32 2147483647, %v395_v27  ;;  %vm402_vm2 = vweird.f32 %v395_v27 }
 0x147   :  { %641 = vrcp.f32 %v396_v28  ;;  %v423_v38 = vand.u32 2147483648, %v396_v28  ;;  %v421_v40 = vand.u32 2147483647, %v396_v28  ;;  %vm417_vm4 = vweird.f32 %v396_v28 }
 0x148   :  { %v409_v42 = vor.u32 1.1754944e-38, %v408_v35  ;;  %vm407_vm5 = vcmp.eq.f32.partialorder %v406_v37, 8.507059e+37 }
 0x149   :  { %v424_v45 = vor.u32 1.1754944e-38, %v423_v38  ;;  %vm422_vm7 = vcmp.eq.f32.partialorder %v421_v40, 8.507059e+37 }
 0x14c   :  { %v640_v29 = vpop.eup %639 }
 0x14d   :  { %v642_v30 = vpop.eup %641  ;;  %v398_v31 = vmul.f32 %v640_v29, %v395_v27  ;;  %vm403_vm0 = vweird.f32 %v640_v29 }
 0x14e   :  { %v413_v32 = vmul.f32 %v642_v30, %v396_v28  ;;  %vm418_vm1 = vweird.f32 %v642_v30  ;;  %vm404_vm3 = vmor %vm402_vm2, %vm403_vm0 }
 0x14f   :  { %v399_v33 = vsub.f32 1.0, %v398_v31  ;;  %vm419_vm6 = vmor %vm417_vm4, %vm418_vm1 }
 0x150   :  { %v414_v34 = vsub.f32 1.0, %v413_v32 }
 0x151   :  { %v400_v36 = vmul.f32 %v640_v29, %v399_v33 }
 0x152   :  { %v415_v39 = vmul.f32 %v642_v30, %v414_v34 }
 0x153   :  { %v401_v41 = vadd.f32 %v640_v29, %v400_v36 }
 0x154   :  { %v416_v43 = vadd.f32 %v642_v30, %v415_v39 }
 0x155   :  { %v405_v44 = vsel %vm404_vm3, %v640_v29, %v401_v41 }
 0x156   :  { %v410_v46 = vsel %vm407_vm5, %v409_v42, %v405_v44  ;;  %v420_v47 = vsel %vm419_vm6, %v642_v30, %v416_v43 }
 0x157   :  { %v425_v48 = vsel %vm422_vm7, %v424_v45, %v420_v47  ;;  %427 = vst [vmem:[#allocation10] sm:$0xff] %v410_v46 }
 0x158   :  { %428 = vst [vmem:[#allocation10 + $0x8] sm:$0xff] %v425_v48 }
 0x159   :  { %450 = dma.vmem_to_hbm [thread:$0]  %s446_s5, 256, %s448_s23, [#allocation11]  }
 0x15a   :  { %767 = dma.done.wait [#allocation5], 128  }
 0x15b   :  { %768 = vsyncadd [#allocation5], 4294967168 }
 0x15c   :  { %769 = dma.done.wait [#allocation11], 256  }
 0x15d   :  { %770 = vsyncadd [#allocation11], 4294967040 }
 0x15e   :  { %459 = vsyncpa [#allocation4], 1 }
 0x15f   :  { %460 = vsyncpa [#allocation7], 1 }
 0x160   :  { %461 = vsyncpa [#allocation5], 1 }
 0x161   :  { %462 = vsyncpa [#allocation11], 1 }

</bundles_post_ra>
